<compile_context>
chip_gen: v6e
topology: v6e:2x2x1
jax: 0.10.0
libtpu: 0.0.40
codegen_flags: <defaults>
</compile_context>

<pallas_src>
import jax
import jax.numpy as jnp
from jax.experimental import pallas as pl
from jax.experimental.pallas import tpu as pltpu

IN_FEATURES = 500
NUM_CLASSES = 10
K_PAD = 512            # 500 rounded up to a multiple of 128 lanes
TILE_B = 2048          # batch tile (multiple of 8 sublanes), sized for v5e VMEM


def _round_up(x, m):
    return ((x + m - 1) // m) * m


def _linear_kernel(x_ref, w_ref, b_ref, o_ref):
    # x_ref: (tb, 512)  w_ref: (512, C)  b_ref: (1, C)  o_ref: (tb, C)
    acc = jnp.dot(x_ref[...], w_ref[...], preferred_element_type=jnp.float32)
    o_ref[...] = (acc + b_ref[...]).astype(o_ref.dtype)


def prepare_params(weight, bias):
    """Pack PyTorch-layout params once: (C, 500) -> (512, C) transposed+padded,
    bias (C,) -> (1, C). Do this at init, not per forward."""
    C, K = weight.shape
    w_packed = jnp.zeros((K_PAD, C), weight.dtype).at[:K, :].set(weight.T)
    b_packed = bias.reshape(1, C)
    return w_packed, b_packed


def linear_classifier_forward(features, w_packed, b_packed, *, tile_b=TILE_B):
    """features: (B, 500) f32; w_packed: (512, C); b_packed: (1, C)."""
    B, K = features.shape
    K_pad, C = w_packed.shape

    # Effective batch tile: multiple of 8 (sublane), capped at tile_b.
    tb = min(tile_b, _round_up(B, 8))
    B_pad = _round_up(B, tb)

    # Pad batch to a tile multiple and features to 512 lanes in one copy.
    # Padded weight rows are zero, so the extra x columns are inert.
    x = jnp.pad(features, ((0, B_pad - B), (0, K_pad - K)))

    out = pl.pallas_call(
        _linear_kernel,
        out_shape=jax.ShapeDtypeStruct((B_pad, C), features.dtype),
        grid_spec=pltpu.PrefetchScalarGridSpec(
            num_scalar_prefetch=0,
            grid=(B_pad // tb,),
            in_specs=[
                pl.BlockSpec((tb, K_pad), lambda i: (i, 0)),      # x tile, pipelined
                pl.BlockSpec((K_pad, C), lambda i: (0, 0)),       # weight, resident
                pl.BlockSpec((1, C), lambda i: (0, 0)),           # bias, resident
            ],
            out_specs=pl.BlockSpec((tb, C), lambda i: (i, 0)),
        ),
        compiler_params=pltpu.CompilerParams(
            dimension_semantics=("parallel",)),                   # shard across TCs (v7x)
    )(x, w_packed, b_packed)

    return out[:B]


def init_params(key, num_classes=NUM_CLASSES, in_features=IN_FEATURES):
    # Mimics PyTorch nn.Linear default init: U(-1/sqrt(fan_in), 1/sqrt(fan_in)).
    kw, kb = jax.random.split(key)
    bound = 1.0 / jnp.sqrt(jnp.float32(in_features))
    weight = jax.random.uniform(kw, (num_classes, in_features),
                                dtype=jnp.float32, minval=-bound, maxval=bound)
    bias = jax.random.uniform(kb, (num_classes,),
                              dtype=jnp.float32, minval=-bound, maxval=bound)
    return weight, bias


if __name__ == "__main__":
    key = jax.random.PRNGKey(0)
    k_x, k_p = jax.random.split(key)

    batch = 2
    features = jax.random.normal(k_x, (batch, IN_FEATURES), dtype=jnp.float32)
    weight, bias = init_params(k_p)

    # Param packing happens once (hoisted out of the forward path).
    w_packed, b_packed = prepare_params(weight, bias)

    out = linear_classifier_forward(features, w_packed, b_packed)
    out = jax.block_until_ready(out)

    # Sanity check against plain-JAX reference (same semantics as F.linear).
    ref = features @ weight.T + bias
    assert out.shape == (batch, NUM_CLASSES)
    assert jnp.allclose(out, ref, atol=1e-5, rtol=1e-5)

    print("KERNEL_OK")
</pallas_src>

<mosaic_0001>
module attributes {stable_mosaic.version = 11 : i64} {
  func.func @_linear_kernel(%arg0: i32, %arg1: memref<8x512xf32, #tpu.memory_space<vmem>>, %arg2: memref<512x10xf32, #tpu.memory_space<vmem>>, %arg3: memref<1x10xf32, #tpu.memory_space<vmem>>, %arg4: memref<8x10xf32, #tpu.memory_space<vmem>>) attributes {dimension_semantics = [#tpu.dimension_semantics<parallel>], iteration_bounds = array<i64: 1>, scalar_prefetch = 0 : i64, scratch_operands = 0 : i64, tpu.core_type = #tpu.core_type<tc>, window_params = [{transform_indices = @transform_0, window_bounds = array<i64: 8, 512>}, {pipeline_mode = #tpu.pipeline_mode<synchronous>, transform_indices = @transform_1, window_bounds = array<i64: 512, 10>}, {pipeline_mode = #tpu.pipeline_mode<synchronous>, transform_indices = @transform_2, window_bounds = array<i64: 1, 10>}, {transform_indices = @transform_3, window_bounds = array<i64: 8, 10>}]} {
    %c0 = arith.constant 0 : index
    %c0_0 = arith.constant 0 : index
    %0 = vector.load %arg1[%c0, %c0_0] : memref<8x512xf32, #tpu.memory_space<vmem>>, vector<8x512xf32>
    %c0_1 = arith.constant 0 : index
    %c0_2 = arith.constant 0 : index
    %1 = vector.load %arg2[%c0_1, %c0_2] : memref<512x10xf32, #tpu.memory_space<vmem>>, vector<512x10xf32>
    %cst = arith.constant dense<0.000000e+00> : vector<8x10xf32>
    %2 = tpu.matmul %0, %1, %cst {dimension_numbers = #tpu.dot_dimension_numbers<[1], [0], [0], [1], [0, 0, 1, 1], [], []>} : vector<8x512xf32>, vector<512x10xf32>, vector<8x10xf32> -> vector<8x10xf32>
    %c0_3 = arith.constant 0 : index
    %c0_4 = arith.constant 0 : index
    %3 = vector.load %arg3[%c0_3, %c0_4] : memref<1x10xf32, #tpu.memory_space<vmem>>, vector<1x10xf32>
    %4 = vector.broadcast %3 : vector<1x10xf32> to vector<8x10xf32>
    %5 = arith.addf %2, %4 : vector<8x10xf32>
    %c0_5 = arith.constant 0 : index
    %c0_6 = arith.constant 0 : index
    %6 = vector.load %arg4[%c0_5, %c0_6] : memref<8x10xf32, #tpu.memory_space<vmem>>, vector<8x10xf32>
    tpu.vector_store %arg4[%c0_5, %c0_6], %5 {strides = array<i32>} : memref<8x10xf32, #tpu.memory_space<vmem>>, vector<8x10xf32>,
    return
  }
  func.func @transform_0(%arg0: i32) -> (i32, i32) {
    %c0_i32 = arith.constant 0 : i32
    %c0_i32_0 = arith.constant 0 : i32
    return %arg0, %c0_i32 : i32, i32
  }
  func.func @transform_1(%arg0: i32) -> (i32, i32) {
    %c0_i32 = arith.constant 0 : i32
    %c0_i32_0 = arith.constant 0 : i32
    %c0_i32_1 = arith.constant 0 : i32
    return %c0_i32, %c0_i32_0 : i32, i32
  }
  func.func @transform_2(%arg0: i32) -> (i32, i32) {
    %c0_i32 = arith.constant 0 : i32
    %c0_i32_0 = arith.constant 0 : i32
    %c0_i32_1 = arith.constant 0 : i32
    return %c0_i32, %c0_i32_0 : i32, i32
  }
  func.func @transform_3(%arg0: i32) -> (i32, i32) {
    %c0_i32 = arith.constant 0 : i32
    %c0_i32_0 = arith.constant 0 : i32
    return %arg0, %c0_i32 : i32, i32
  }
}

</mosaic_0001>

<bundles_post_ra>
// kernel: tpu_custom_call.1
= control target key start
LH: loop header
LB: loop body
LE: loop exit
PB: predicated region body
PF: predicated region fallthrough
CT: control target
= control target key end

     0   :  { %s571_s0 = inlined_call_operand.vmem [shape: f32[8,512], index: 0, kind: input, shape index: {}]   ;;  %s572_s1 = inlined_call_operand.vmem [shape: f32[512,10], index: 1, kind: input, shape index: {}]   ;;  %s573_s2 = inlined_call_operand.vmem [shape: f32[1,10], index: 2, kind: input, shape index: {}]   ;;  %s574_s3 = inlined_call_operand.hbm [shape: f32[8,10], index: 3, kind: output, shape index: {}]  }
   0x1   :  { %v50_v0 = vld [vmem:[%s572_s1 + $0xf8] sm:$0xff]  ;;  %v49_v4 = vld [vmem:[%s572_s1 + $0xf0] sm:$0xff]  ;;  %v48_v8 = vld [vmem:[%s572_s1 + $0xe8] sm:$0xff] }
   0x2   :  { %v82_v1 = vld [vmem:[%s572_s1 + $0x1f8] sm:$0xff]  ;;  %247 = vmatprep.subr.mxu0 %v50_v0  ;;  %v81_v5 = vld [vmem:[%s572_s1 + $0x1f0] sm:$0xff]  ;;  %v80_v9 = vld [vmem:[%s572_s1 + $0x1e8] sm:$0xff] }
   0x3   :  { %v34_v2 = vld [vmem:[%s572_s1 + $0x78] sm:$0xff]  ;;  %282 = vmatprep.subr.mxu1 %v82_v1  ;;  %v33_v6 = vld [vmem:[%s572_s1 + $0x70] sm:$0xff]  ;;  %v32_v10 = vld [vmem:[%s572_s1 + $0x68] sm:$0xff] }
   0x4   :  { %v66_v3 = vld [vmem:[%s572_s1 + $0x178] sm:$0xff]  ;;  %248 = vmatpush3.msra.mxu0 %v34_v2  ;;  %v65_v7 = vld [vmem:[%s572_s1 + $0x170] sm:$0xff]  ;;  %v64_v11 = vld [vmem:[%s572_s1 + $0x168] sm:$0xff] }
   0x5   :  { %283 = vmatpush3.msra.mxu1 %v66_v3  ;;  %249 = vmatprep.subr.mxu0 %v49_v4  ;;  %v47_v12 = vld [vmem:[%s572_s1 + $0xe0] sm:$0xff]  ;;  %v46_v16 = vld [vmem:[%s572_s1 + $0xd8] sm:$0xff]  ;;  %v45_v20 = vld [vmem:[%s572_s1 + $0xd0] sm:$0xff] }
   0x6   :  { %284 = vmatprep.subr.mxu1 %v81_v5  ;;  %250 = vmatpush3.msra.mxu0 %v33_v6  ;;  %v79_v13 = vld [vmem:[%s572_s1 + $0x1e0] sm:$0xff]  ;;  %v78_v17 = vld [vmem:[%s572_s1 + $0x1d8] sm:$0xff]  ;;  %v77_v21 = vld [vmem:[%s572_s1 + $0x1d0] sm:$0xff] }
   0x7   :  { %285 = vmatpush3.msra.mxu1 %v65_v7  ;;  %251 = vmatprep.subr.mxu0 %v48_v8  ;;  %v31_v14 = vld [vmem:[%s572_s1 + $0x60] sm:$0xff]  ;;  %v30_v18 = vld [vmem:[%s572_s1 + $0x58] sm:$0xff]  ;;  %v29_v22 = vld [vmem:[%s572_s1 + $0x50] sm:$0xff] }
   0x8   :  { %286 = vmatprep.subr.mxu1 %v80_v9  ;;  %v63_v15 = vld [vmem:[%s572_s1 + $0x160] sm:$0xff]  ;;  %252 = vmatpush3.msra.mxu0 %v32_v10  ;;  %v62_v19 = vld [vmem:[%s572_s1 + $0x158] sm:$0xff]  ;;  %v61_v23 = vld [vmem:[%s572_s1 + $0x150] sm:$0xff] }
   0x9   :  { %287 = vmatpush3.msra.mxu1 %v64_v11  ;;  %253 = vmatprep.subr.mxu0 %v47_v12  ;;  %v44_v24 = vld [vmem:[%s572_s1 + $0xc8] sm:$0xff]  ;;  %v43_v28 = vld [vmem:[%s572_s1 + $0xc0] sm:$0xff]  ;;  %v42_v32 = vld [vmem:[%s572_s1 + $0xb8] sm:$0xff] }
   0xa   :  { %288 = vmatprep.subr.mxu1 %v79_v13  ;;  %254 = vmatpush3.msra.mxu0 %v31_v14  ;;  %v76_v25 = vld [vmem:[%s572_s1 + $0x1c8] sm:$0xff]  ;;  %v75_v29 = vld [vmem:[%s572_s1 + $0x1c0] sm:$0xff]  ;;  %v74_v33 = vld [vmem:[%s572_s1 + $0x1b8] sm:$0xff] }
   0xb   :  { %289 = vmatpush3.msra.mxu1 %v63_v15  ;;  %255 = vmatprep.subr.mxu0 %v46_v16  ;;  %v28_v26 = vld [vmem:[%s572_s1 + $0x48] sm:$0xff]  ;;  %v27_v30 = vld [vmem:[%s572_s1 + $0x40] sm:$0xff]  ;;  %v26_v34 = vld [vmem:[%s572_s1 + $0x38] sm:$0xff] }
   0xc   :  { %290 = vmatprep.subr.mxu1 %v78_v17  ;;  %256 = vmatpush3.msra.mxu0 %v30_v18  ;;  %v60_v27 = vld [vmem:[%s572_s1 + $0x148] sm:$0xff]  ;;  %v59_v31 = vld [vmem:[%s572_s1 + $0x140] sm:$0xff]  ;;  %v58_v35 = vld [vmem:[%s572_s1 + $0x138] sm:$0xff] }
   0xd   :  { %291 = vmatpush3.msra.mxu1 %v62_v19  ;;  %257 = vmatprep.subr.mxu0 %v45_v20  ;;  %v41_v36 = vld [vmem:[%s572_s1 + $0xb0] sm:$0xff]  ;;  %v40_v40 = vld [vmem:[%s572_s1 + $0xa8] sm:$0xff]  ;;  %v39_v44 = vld [vmem:[%s572_s1 + $0xa0] sm:$0xff] }
   0xe   :  { %292 = vmatprep.subr.mxu1 %v77_v21  ;;  %258 = vmatpush3.msra.mxu0 %v29_v22  ;;  %v73_v37 = vld [vmem:[%s572_s1 + $0x1b0] sm:$0xff]  ;;  %v72_v41 = vld [vmem:[%s572_s1 + $0x1a8] sm:$0xff]  ;;  %v71_v45 = vld [vmem:[%s572_s1 + $0x1a0] sm:$0xff] }
   0xf   :  { %293 = vmatpush3.msra.mxu1 %v61_v23  ;;  %259 = vmatprep.subr.mxu0 %v44_v24  ;;  %v25_v38 = vld [vmem:[%s572_s1 + $0x30] sm:$0xff]  ;;  %v24_v42 = vld [vmem:[%s572_s1 + $0x28] sm:$0xff]  ;;  %v23_v46 = vld [vmem:[%s572_s1 + $0x20] sm:$0xff] }
  0x10   :  { %294 = vmatprep.subr.mxu1 %v76_v25  ;;  %260 = vmatpush3.msra.mxu0 %v28_v26  ;;  %v57_v39 = vld [vmem:[%s572_s1 + $0x130] sm:$0xff]  ;;  %v56_v43 = vld [vmem:[%s572_s1 + $0x128] sm:$0xff]  ;;  %v55_v47 = vld [vmem:[%s572_s1 + $0x120] sm:$0xff] }
  0x11   :  { %295 = vmatpush3.msra.mxu1 %v60_v27  ;;  %261 = vmatprep.subr.mxu0 %v43_v28  ;;  %v38_v48 = vld [vmem:[%s572_s1 + $0x98] sm:$0xff] }
  0x12   :  { %296 = vmatprep.subr.mxu1 %v75_v29  ;;  %262 = vmatpush3.msra.mxu0 %v27_v30  ;;  %v70_v49 = vld [vmem:[%s572_s1 + $0x198] sm:$0xff] }
  0x13   :  { %297 = vmatpush3.msra.mxu1 %v59_v31  ;;  %263 = vmatprep.subr.mxu0 %v42_v32 }
  0x14   :  { %298 = vmatprep.subr.mxu1 %v74_v33  ;;  %264 = vmatpush3.msra.mxu0 %v26_v34 }
  0x15   :  { %299 = vmatpush3.msra.mxu1 %v58_v35  ;;  %265 = vmatprep.subr.mxu0 %v41_v36 }
  0x16   :  { %300 = vmatprep.subr.mxu1 %v73_v37  ;;  %266 = vmatpush3.msra.mxu0 %v25_v38 }
  0x17   :  { %301 = vmatpush3.msra.mxu1 %v57_v39  ;;  %267 = vmatprep.subr.mxu0 %v40_v40 }
  0x18   :  { %302 = vmatprep.subr.mxu1 %v72_v41  ;;  %268 = vmatpush3.msra.mxu0 %v24_v42 }
  0x19   :  { %303 = vmatpush3.msra.mxu1 %v56_v43 }
  0x1a   :  { %8 = vsyncpa [#allocation3], 0  ;;  %269 = vmatprep.subr.mxu0 %v39_v44  ;;  %304 = vmatprep.subr.mxu1 %v71_v45  ;;  %v22_v50 = vld [vmem:[%s572_s1 + $0x18] sm:$0xff]  ;;  %v37_v52 = vld [vmem:[%s572_s1 + $0x90] sm:$0xff]  ;;  %s340_s14 = smov [#allocation2]   ;;  %vm230_vm0 = vcmask 80896  }
  0x1b   :  { %v54_v51 = vld [vmem:[%s572_s1 + $0x118] sm:$0xff]  ;;  %270 = vmatpush3.msra.mxu0 %v23_v46  ;;  %305 = vmatpush3.msra.mxu1 %v55_v47  ;;  %v69_v53 = vld [vmem:[%s572_s1 + $0x190] sm:$0xff]  ;;  %v36_v56 = vld [vmem:[%s572_s1 + $0x88] sm:$0xff]  ;;  %s238_s15 = sshll.u32 %s340_s14, 4  ;;  %s239_s15 = int_to_ptr.vmem [resolvable:$true] %s238_s15 }
  0x1c   :  { %271 = vmatprep.subr.mxu0 %v38_v48  ;;  %306 = vmatprep.subr.mxu1 %v70_v49  ;;  %v21_v54 = vld [vmem:[%s572_s1 + $0x10] sm:$0xff]  ;;  %v68_v57 = vld [vmem:[%s572_s1 + $0x188] sm:$0xff]  ;;  %v35_v60 = vld [vmem:[%s572_s1 + $0x80] sm:$0xff]  ;;  %p323_p1 = scmp.lt.s32.totalorder %s239_s15, %s239_s15 }
  0x1d   :  { %v53_v55 = vld [vmem:[%s572_s1 + $0x110] sm:$0xff]  ;;  %272 = vmatpush3.msra.mxu0 %v22_v50  ;;  %307 = vmatpush3.msra.mxu1 %v54_v51  ;;  %v20_v58 = vld [vmem:[%s572_s1 + $0x8] sm:$0xff]  ;;  %v67_v61 = vld [vmem:[%s572_s1 + $0x180] sm:$0xff] }
  0x1e   :  { %273 = vmatprep.subr.mxu0 %v37_v52  ;;  %308 = vmatprep.subr.mxu1 %v69_v53  ;;  %v52_v59 = vld [vmem:[%s572_s1 + $0x108] sm:$0xff]  ;;  %v19_v62 = vld [vmem:[%s572_s1] sm:$0xff]  ;;  %v18_v1 = vld [vmem:[%s571_s0 + $0x18] sm:$0xff] }
  0x1f   :  { %274 = vmatpush3.msra.mxu0 %v21_v54  ;;  %309 = vmatpush3.msra.mxu1 %v53_v55  ;;  %v16_v63 = vld [vmem:[%s571_s0 + $0x8] sm:$0xff]  ;;  %v51_v0 = vld [vmem:[%s572_s1 + $0x100] sm:$0xff]  ;;  %v17_v3 = vld [vmem:[%s571_s0 + $0x10] sm:$0xff] }
  0x20   :  { %275 = vmatprep.subr.mxu0 %v36_v56  ;;  %310 = vmatprep.subr.mxu1 %v68_v57  ;;  %v15_v2 = vld [vmem:[%s571_s0] sm:$0xff]  ;;  %s318_s0 = scalar_lea.vmem %s239_s15, 128 }
  0x21   :  { %276 = vmatpush3.msra.mxu0 %v20_v58  ;;  %311 = vmatpush3.msra.mxu1 %v52_v59  ;;  %v246_v6 = vld [vmem:[%s573_s2] ss:$0 sm:$0xff]  ;;  %p319_p0 = scmp.ne.s32.totalorder %s239_s15, %s318_s0  ;;  %p324_p2 = scmp.lt.s32.totalorder %s318_s0, %s318_s0 }
  0x22   :  { %277 = vmatprep.subr.mxu0 %v35_v60  ;;  %312 = vmatprep.subr.mxu1 %v67_v61 }
  0x23   :  { %278 = vmatpush3.msra.mxu0 %v19_v62  ;;  %154 = vmatprep.mubr.f32.mxu0 %v16_v63  ;;  %p325_p3 = por %p324_p2, %p323_p1 }
  0x24   :  { %313 = vmatpush3.msra.mxu1 %v51_v0  ;;  %224 = vmatprep.mubr.f32.mxu1 %v18_v1 }
  0x25   :  { %155 = vmatmul.mubr.f32.vlgmr.msra.gmra.mxu0 %v15_v2  ;;  %225 = vmatmul.mubr.f32.vlgmr.msra.gmra.mxu1 %v17_v3  ;;  %p326_p4 = pnand %p325_p3, %p319_p0 }
  0xe5   :  { %v279_v4 = vpop.f32.mrf.mxu0  ;;  %v314_v5 = vpop.f32.mrf.mxu1 }
  0xe7   :  { %v280_v7 = vpop.f32.mrf.mxu0  ;;  %v315_v8 = vpop.f32.mrf.mxu1 }
  0xe8   :  { %v281_v9 = vadd.f32 %v280_v7, %v279_v4  ;;  %v316_v11 = vadd.f32 %v315_v8, %v314_v5 }
  0xea   :  { %v157_v10 = vadd.f32 %v281_v9, %v246_v6 }
  0xec   :  { %v227_v12 = vadd.f32 %v316_v11, %v157_v10 }
  0xee   :  { %231 = vst.msk [vmem:[#allocation2] sm:$0xff] %vm230_vm0, %v227_v12 }
  0xef   :  { %329 = shalt.err (!%p326_p4)
}
  0xf0   :  { %241 = dma.vmem_to_hbm [thread:$0]  %s239_s15, 128, %s574_s3, [#allocation3]  }
  0xf1   :  { %338 = dma.done.wait [#allocation3], 128  }
  0xf2   :  { %339 = vsyncadd [#allocation3], 4294967168 }
  0xf3   :  { %245 = vsyncpa [#allocation3], 1 }

</bundles_post_ra>
